<compile_context>
chip_gen: v7x
topology: tpu7x:2x2x1
jax: 0.10.0
libtpu: 0.0.40
codegen_flags: <defaults>
</compile_context>

<pallas_src>
import functools

import jax
import jax.numpy as jnp
from jax.experimental import pallas as pl
from jax.experimental.pallas import tpu as pltpu

LANE = 128      # vreg lane width
SUBLANE = 8     # vreg sublane count (f32)


def _round_up(x, m):
    return ((x + m - 1) // m) * m


def deep_fc_dqn_kernel(x_ref,
                       w1_ref, b1_ref,
                       w2_ref, b2_ref,
                       w3_ref, b3_ref,
                       w4_ref, b4_ref,
                       w5_ref, b5_ref,
                       o_ref):
    """5x (matmul + bias [+ ReLU]) on one batch tile, everything in VMEM."""
    x = x_ref[...]                      # already bf16 (cast fused into host-side pad)

    # Hoisted single bias reads: one (1, out) broadcast per layer per tile.
    b1 = b1_ref[...]
    b2 = b2_ref[...]
    b3 = b3_ref[...]
    b4 = b4_ref[...]
    b5 = b5_ref[...]

    h = jnp.dot(x, w1_ref[...], preferred_element_type=jnp.float32) + b1
    h = jnp.maximum(h, 0.0)

    h = jnp.dot(h.astype(jnp.bfloat16), w2_ref[...],
                preferred_element_type=jnp.float32) + b2
    h = jnp.maximum(h, 0.0)

    h = jnp.dot(h.astype(jnp.bfloat16), w3_ref[...],
                preferred_element_type=jnp.float32) + b3
    h = jnp.maximum(h, 0.0)

    h = jnp.dot(h.astype(jnp.bfloat16), w4_ref[...],
                preferred_element_type=jnp.float32) + b4
    h = jnp.maximum(h, 0.0)

    out = jnp.dot(h.astype(jnp.bfloat16), w5_ref[...],
                  preferred_element_type=jnp.float32) + b5
    # Store only the real action lanes (o_ref last dim == true #outputs):
    # avoids writing a 32x lane-padded f32 slab back to HBM at large batch.
    o_ref[...] = out[:, :o_ref.shape[1]].astype(o_ref.dtype)


def prepare_params(params):
    """One-time padding + bf16 cast of the weights (do NOT call per forward).

    params: list of (W, b) with W [in_features, out_features] f32, b [1, out] f32.
    Returns a tuple of (padded bf16 W, padded f32 b) pairs ready for the kernel.
    Zero padding keeps the math exact: zero rows/cols of W and zero bias lanes
    contribute nothing, and relu(0) = 0 keeps padded hidden lanes exactly zero.
    """
    in_features, hidden = params[0][0].shape
    outputs = params[-1][0].shape[1]

    # 256-aligned hidden tiles fill the 256x256 MXU on v6e/v7x once hidden is
    # large; at small hidden (and on v5e's 4x128^2 MXUs) 128 is already native.
    hid_align = 256 if hidden >= 256 else LANE
    in_p = _round_up(in_features, LANE)
    hid_p = _round_up(hidden, hid_align)
    out_p = _round_up(outputs, LANE)

    padded_dims = [(in_p, hid_p), (hid_p, hid_p), (hid_p, hid_p),
                   (hid_p, hid_p), (hid_p, out_p)]
    prepared = []
    for (w, b), (pi, po) in zip(params, padded_dims):
        wp = (jnp.zeros((pi, po), jnp.bfloat16)
              .at[:w.shape[0], :w.shape[1]].set(w.astype(jnp.bfloat16)))
        bp = jnp.zeros((1, po), jnp.float32).at[:, :b.shape[1]].set(b)
        prepared.append((wp, bp))
    return tuple(prepared)


@functools.partial(jax.jit, static_argnames=("outputs", "block_batch"))
def deep_fc_dqn_forward(x, prepared, *, outputs, block_batch=1024):
    """x: [batch, input_shape] f32; prepared: output of prepare_params().

    Returns [batch, outputs] f32 Q-values.
    """
    batch, in_features = x.shape
    in_p, hid_p = prepared[0][0].shape
    out_p = prepared[-1][0].shape[1]

    # Balanced batch tiles: avoids near-2x padding for awkward batch sizes
    # (e.g. block_batch + epsilon). Per-grid-step overhead (~0.35us) is
    # amortized by the large default tile.
    num_tiles = -(-batch // block_batch)
    tb = _round_up(-(-batch // num_tiles), SUBLANE)
    batch_p = num_tiles * tb
    grid = (num_tiles,)

    # Pad x directly in bf16 (cast fused into the pad under jit): halves the
    # x HBM->VMEM DMA bytes and removes the in-kernel cast pass.
    x_p = (jnp.zeros((batch_p, in_p), jnp.bfloat16)
           .at[:batch, :in_features].set(x.astype(jnp.bfloat16)))

    flat_args = [x_p]
    weight_specs = []
    for (wp, bp) in prepared:
        pi, po = wp.shape
        flat_args.extend([wp, bp])
        # Constant index_map -> weights/biases are fetched once and stay
        # VMEM-resident across all batch tiles while x/out double-buffer.
        # (If hidden ever scales toward v7x's 64 MiB VMEM, add
        #  pipeline_mode=pl.Buffered(1) here to single-buffer the weights.)
        weight_specs.append(pl.BlockSpec((pi, po), lambda i: (0, 0)))
        weight_specs.append(pl.BlockSpec((1, po), lambda i: (0, 0)))

    in_specs = [pl.BlockSpec((tb, in_p), lambda i: (i, 0))] + weight_specs
    # Full-dim last axis (== true #actions) is legal; accepts a masked vst but
    # cuts output HBM traffic 32x vs a 128-lane-padded f32 slab.
    out_spec = pl.BlockSpec((tb, outputs), lambda i: (i, 0))

    # VMEM budget from actual buffer sizes (single-copy params + double-
    # buffered x/out tiles) with 2x headroom, instead of a blanket 32 MiB.
    param_bytes = sum(int(a.size) * a.dtype.itemsize for a in flat_args[1:])
    x_tile_bytes = tb * in_p * 2                       # bf16 tile
    out_tile_bytes = tb * max(outputs, LANE) * 4       # f32 tile (lane-padded in VMEM)
    vmem_bytes = 2 * (param_bytes + 2 * (x_tile_bytes + out_tile_bytes))
    vmem_bytes = int(min(64 << 20, max(8 << 20, vmem_bytes)))

    # Advisory cost hint so XLA can overlap this call with surrounding work.
    flops = 2 * batch_p * (in_p * hid_p + 3 * hid_p * hid_p + hid_p * out_p)
    bytes_accessed = int(x_p.size) * 2 + param_bytes + batch_p * outputs * 4
    cost = pl.CostEstimate(flops=flops, transcendentals=0,
                           bytes_accessed=bytes_accessed)

    y_p = pl.pallas_call(
        deep_fc_dqn_kernel,
        out_shape=jax.ShapeDtypeStruct((batch_p, outputs), jnp.float32),
        grid=grid,
        in_specs=in_specs,
        out_specs=out_spec,
        compiler_params=pltpu.CompilerParams(
            # Batch tiles are independent. (On v7x, CORE_PARALLEL on this axis
            # would split tiles across the two TensorCores; kept portable here.)
            dimension_semantics=("parallel",),
            vmem_limit_bytes=vmem_bytes,
        ),
        cost_estimate=cost,
    )(*flat_args)

    # Only the padded batch rows need stripping; the lane axis is already exact.
    return y_p[:batch, :]


def init_params(key, input_shape, outputs, hidden=64):
    """Deterministic init mimicking nn.Linear default (uniform +-1/sqrt(fan_in))."""
    dims = [(input_shape, hidden), (hidden, hidden), (hidden, hidden),
            (hidden, hidden), (hidden, outputs)]
    params = []
    for (fan_in, fan_out) in dims:
        key, kw, kb = jax.random.split(key, 3)
        bound = 1.0 / jnp.sqrt(jnp.float32(fan_in))
        w = jax.random.uniform(kw, (fan_in, fan_out), jnp.float32, -bound, bound)
        b = jax.random.uniform(kb, (1, fan_out), jnp.float32, -bound, bound)
        params.append((w, b))
    return params


def reference_forward(x, params):
    h = x
    for (w, b) in params[:-1]:
        h = jnp.maximum(h @ w + b, 0.0)
    w, b = params[-1]
    return h @ w + b


if __name__ == "__main__":
    key = jax.random.PRNGKey(0)

    batch = 8
    input_shape = 16   # flat observation size
    hidden = 32
    outputs = 4        # number of actions

    key, kx = jax.random.split(key)
    x = jax.random.normal(kx, (batch, input_shape), dtype=jnp.float32)

    params = init_params(key, input_shape, outputs, hidden=hidden)
    prepared = prepare_params(params)   # one-time pad + bf16 cast (steady-state reuse)

    y = deep_fc_dqn_forward(x, prepared, outputs=outputs)
    y = jax.block_until_ready(y)

    y_ref = reference_forward(x, params)
    assert y.shape == (batch, outputs)
    # bf16 matmul inputs (f32 accumulation) -> loosened tolerance vs f32 reference.
    assert jnp.allclose(y, y_ref, atol=5e-2, rtol=5e-2), \
        float(jnp.max(jnp.abs(y - y_ref)))

    print("KERNEL_OK")
</pallas_src>

<mosaic_0001>
module attributes {stable_mosaic.version = 11 : i64} {
  func.func @deep_fc_dqn_kernel(%arg0: i32, %arg1: memref<8x128xbf16, #tpu.memory_space<vmem>>, %arg2: memref<128x128xbf16, #tpu.memory_space<vmem>>, %arg3: memref<1x128xf32, #tpu.memory_space<vmem>>, %arg4: memref<128x128xbf16, #tpu.memory_space<vmem>>, %arg5: memref<1x128xf32, #tpu.memory_space<vmem>>, %arg6: memref<128x128xbf16, #tpu.memory_space<vmem>>, %arg7: memref<1x128xf32, #tpu.memory_space<vmem>>, %arg8: memref<128x128xbf16, #tpu.memory_space<vmem>>, %arg9: memref<1x128xf32, #tpu.memory_space<vmem>>, %arg10: memref<128x128xbf16, #tpu.memory_space<vmem>>, %arg11: memref<1x128xf32, #tpu.memory_space<vmem>>, %arg12: memref<8x4xf32, #tpu.memory_space<vmem>>) attributes {dimension_semantics = [#tpu.dimension_semantics<parallel>], iteration_bounds = array<i64: 1>, scalar_prefetch = 0 : i64, scratch_operands = 0 : i64, tpu.core_type = #tpu.core_type<tc>, window_params = [{transform_indices = @transform_0, window_bounds = array<i64: 8, 128>}, {pipeline_mode = #tpu.pipeline_mode<synchronous>, transform_indices = @transform_1, window_bounds = array<i64: 128, 128>}, {pipeline_mode = #tpu.pipeline_mode<synchronous>, transform_indices = @transform_2, window_bounds = array<i64: 1, 128>}, {pipeline_mode = #tpu.pipeline_mode<synchronous>, transform_indices = @transform_3, window_bounds = array<i64: 128, 128>}, {pipeline_mode = #tpu.pipeline_mode<synchronous>, transform_indices = @transform_4, window_bounds = array<i64: 1, 128>}, {pipeline_mode = #tpu.pipeline_mode<synchronous>, transform_indices = @transform_5, window_bounds = array<i64: 128, 128>}, {pipeline_mode = #tpu.pipeline_mode<synchronous>, transform_indices = @transform_6, window_bounds = array<i64: 1, 128>}, {pipeline_mode = #tpu.pipeline_mode<synchronous>, transform_indices = @transform_7, window_bounds = array<i64: 128, 128>}, {pipeline_mode = #tpu.pipeline_mode<synchronous>, transform_indices = @transform_8, window_bounds = array<i64: 1, 128>}, {pipeline_mode = #tpu.pipeline_mode<synchronous>, transform_indices = @transform_9, window_bounds = array<i64: 128, 128>}, {pipeline_mode = #tpu.pipeline_mode<synchronous>, transform_indices = @transform_10, window_bounds = array<i64: 1, 128>}, {transform_indices = @transform_11, window_bounds = array<i64: 8, 4>}]} {
    %c0 = arith.constant 0 : index
    %c0_0 = arith.constant 0 : index
    %0 = vector.load %arg1[%c0, %c0_0] : memref<8x128xbf16, #tpu.memory_space<vmem>>, vector<8x128xbf16>
    %c0_1 = arith.constant 0 : index
    %c0_2 = arith.constant 0 : index
    %1 = vector.load %arg3[%c0_1, %c0_2] : memref<1x128xf32, #tpu.memory_space<vmem>>, vector<1x128xf32>
    %c0_3 = arith.constant 0 : index
    %c0_4 = arith.constant 0 : index
    %2 = vector.load %arg5[%c0_3, %c0_4] : memref<1x128xf32, #tpu.memory_space<vmem>>, vector<1x128xf32>
    %c0_5 = arith.constant 0 : index
    %c0_6 = arith.constant 0 : index
    %3 = vector.load %arg7[%c0_5, %c0_6] : memref<1x128xf32, #tpu.memory_space<vmem>>, vector<1x128xf32>
    %c0_7 = arith.constant 0 : index
    %c0_8 = arith.constant 0 : index
    %4 = vector.load %arg9[%c0_7, %c0_8] : memref<1x128xf32, #tpu.memory_space<vmem>>, vector<1x128xf32>
    %c0_9 = arith.constant 0 : index
    %c0_10 = arith.constant 0 : index
    %5 = vector.load %arg11[%c0_9, %c0_10] : memref<1x128xf32, #tpu.memory_space<vmem>>, vector<1x128xf32>
    %c0_11 = arith.constant 0 : index
    %c0_12 = arith.constant 0 : index
    %6 = vector.load %arg2[%c0_11, %c0_12] : memref<128x128xbf16, #tpu.memory_space<vmem>>, vector<128x128xbf16>
    %cst = arith.constant dense<0.000000e+00> : vector<8x128xf32>
    %7 = tpu.matmul %0, %6, %cst {dimension_numbers = #tpu.dot_dimension_numbers<[1], [0], [0], [1], [0, 0, 1, 1], [], []>} : vector<8x128xbf16>, vector<128x128xbf16>, vector<8x128xf32> -> vector<8x128xf32>
    %8 = vector.broadcast %1 : vector<1x128xf32> to vector<8x128xf32>
    %9 = arith.addf %7, %8 : vector<8x128xf32>
    %cst_13 = arith.constant 0.000000e+00 : f32
    %10 = vector.broadcast %cst_13 : f32 to vector<8x128xf32>
    %11 = arith.maximumf %9, %10 : vector<8x128xf32>
    %12 = arith.truncf %11 : vector<8x128xf32> to vector<8x128xbf16>
    %c0_14 = arith.constant 0 : index
    %c0_15 = arith.constant 0 : index
    %13 = vector.load %arg4[%c0_14, %c0_15] : memref<128x128xbf16, #tpu.memory_space<vmem>>, vector<128x128xbf16>
    %cst_16 = arith.constant dense<0.000000e+00> : vector<8x128xf32>
    %14 = tpu.matmul %12, %13, %cst_16 {dimension_numbers = #tpu.dot_dimension_numbers<[1], [0], [0], [1], [0, 0, 1, 1], [], []>} : vector<8x128xbf16>, vector<128x128xbf16>, vector<8x128xf32> -> vector<8x128xf32>
    %15 = vector.broadcast %2 : vector<1x128xf32> to vector<8x128xf32>
    %16 = arith.addf %14, %15 : vector<8x128xf32>
    %cst_17 = arith.constant 0.000000e+00 : f32
    %17 = vector.broadcast %cst_17 : f32 to vector<8x128xf32>
    %18 = arith.maximumf %16, %17 : vector<8x128xf32>
    %19 = arith.truncf %18 : vector<8x128xf32> to vector<8x128xbf16>
    %c0_18 = arith.constant 0 : index
    %c0_19 = arith.constant 0 : index
    %20 = vector.load %arg6[%c0_18, %c0_19] : memref<128x128xbf16, #tpu.memory_space<vmem>>, vector<128x128xbf16>
    %cst_20 = arith.constant dense<0.000000e+00> : vector<8x128xf32>
    %21 = tpu.matmul %19, %20, %cst_20 {dimension_numbers = #tpu.dot_dimension_numbers<[1], [0], [0], [1], [0, 0, 1, 1], [], []>} : vector<8x128xbf16>, vector<128x128xbf16>, vector<8x128xf32> -> vector<8x128xf32>
    %22 = vector.broadcast %3 : vector<1x128xf32> to vector<8x128xf32>
    %23 = arith.addf %21, %22 : vector<8x128xf32>
    %cst_21 = arith.constant 0.000000e+00 : f32
    %24 = vector.broadcast %cst_21 : f32 to vector<8x128xf32>
    %25 = arith.maximumf %23, %24 : vector<8x128xf32>
    %26 = arith.truncf %25 : vector<8x128xf32> to vector<8x128xbf16>
    %c0_22 = arith.constant 0 : index
    %c0_23 = arith.constant 0 : index
    %27 = vector.load %arg8[%c0_22, %c0_23] : memref<128x128xbf16, #tpu.memory_space<vmem>>, vector<128x128xbf16>
    %cst_24 = arith.constant dense<0.000000e+00> : vector<8x128xf32>
    %28 = tpu.matmul %26, %27, %cst_24 {dimension_numbers = #tpu.dot_dimension_numbers<[1], [0], [0], [1], [0, 0, 1, 1], [], []>} : vector<8x128xbf16>, vector<128x128xbf16>, vector<8x128xf32> -> vector<8x128xf32>
    %29 = vector.broadcast %4 : vector<1x128xf32> to vector<8x128xf32>
    %30 = arith.addf %28, %29 : vector<8x128xf32>
    %cst_25 = arith.constant 0.000000e+00 : f32
    %31 = vector.broadcast %cst_25 : f32 to vector<8x128xf32>
    %32 = arith.maximumf %30, %31 : vector<8x128xf32>
    %33 = arith.truncf %32 : vector<8x128xf32> to vector<8x128xbf16>
    %c0_26 = arith.constant 0 : index
    %c0_27 = arith.constant 0 : index
    %34 = vector.load %arg10[%c0_26, %c0_27] : memref<128x128xbf16, #tpu.memory_space<vmem>>, vector<128x128xbf16>
    %cst_28 = arith.constant dense<0.000000e+00> : vector<8x128xf32>
    %35 = tpu.matmul %33, %34, %cst_28 {dimension_numbers = #tpu.dot_dimension_numbers<[1], [0], [0], [1], [0, 0, 1, 1], [], []>} : vector<8x128xbf16>, vector<128x128xbf16>, vector<8x128xf32> -> vector<8x128xf32>
    %36 = vector.broadcast %5 : vector<1x128xf32> to vector<8x128xf32>
    %37 = arith.addf %35, %36 : vector<8x128xf32>
    %38 = vector.extract_strided_slice %37 {offsets = [0, 0], sizes = [8, 4], strides = [1, 1]} : vector<8x128xf32> to vector<8x4xf32>
    %c0_29 = arith.constant 0 : index
    %c0_30 = arith.constant 0 : index
    %39 = vector.load %arg12[%c0_29, %c0_30] : memref<8x4xf32, #tpu.memory_space<vmem>>, vector<8x4xf32>
    tpu.vector_store %arg12[%c0_29, %c0_30], %38 {strides = array<i32>} : memref<8x4xf32, #tpu.memory_space<vmem>>, vector<8x4xf32>,
    return
  }
  func.func @transform_0(%arg0: i32) -> (i32, i32) {
    %c0_i32 = arith.constant 0 : i32
    %c0_i32_0 = arith.constant 0 : i32
    return %arg0, %c0_i32 : i32, i32
  }
  func.func @transform_1(%arg0: i32) -> (i32, i32) {
    %c0_i32 = arith.constant 0 : i32
    %c0_i32_0 = arith.constant 0 : i32
    %c0_i32_1 = arith.constant 0 : i32
    return %c0_i32, %c0_i32_0 : i32, i32
  }
  func.func @transform_2(%arg0: i32) -> (i32, i32) {
    %c0_i32 = arith.constant 0 : i32
    %c0_i32_0 = arith.constant 0 : i32
    %c0_i32_1 = arith.constant 0 : i32
    return %c0_i32, %c0_i32_0 : i32, i32
  }
  func.func @transform_3(%arg0: i32) -> (i32, i32) {
    %c0_i32 = arith.constant 0 : i32
    %c0_i32_0 = arith.constant 0 : i32
    %c0_i32_1 = arith.constant 0 : i32
    return %c0_i32, %c0_i32_0 : i32, i32
  }
  func.func @transform_4(%arg0: i32) -> (i32, i32) {
    %c0_i32 = arith.constant 0 : i32
    %c0_i32_0 = arith.constant 0 : i32
    %c0_i32_1 = arith.constant 0 : i32
    return %c0_i32, %c0_i32_0 : i32, i32
  }
  func.func @transform_5(%arg0: i32) -> (i32, i32) {
    %c0_i32 = arith.constant 0 : i32
    %c0_i32_0 = arith.constant 0 : i32
    %c0_i32_1 = arith.constant 0 : i32
    return %c0_i32, %c0_i32_0 : i32, i32
  }
  func.func @transform_6(%arg0: i32) -> (i32, i32) {
    %c0_i32 = arith.constant 0 : i32
    %c0_i32_0 = arith.constant 0 : i32
    %c0_i32_1 = arith.constant 0 : i32
    return %c0_i32, %c0_i32_0 : i32, i32
  }
  func.func @transform_7(%arg0: i32) -> (i32, i32) {
    %c0_i32 = arith.constant 0 : i32
    %c0_i32_0 = arith.constant 0 : i32
    %c0_i32_1 = arith.constant 0 : i32
    return %c0_i32, %c0_i32_0 : i32, i32
  }
  func.func @transform_8(%arg0: i32) -> (i32, i32) {
    %c0_i32 = arith.constant 0 : i32
    %c0_i32_0 = arith.constant 0 : i32
    %c0_i32_1 = arith.constant 0 : i32
    return %c0_i32, %c0_i32_0 : i32, i32
  }
  func.func @transform_9(%arg0: i32) -> (i32, i32) {
    %c0_i32 = arith.constant 0 : i32
    %c0_i32_0 = arith.constant 0 : i32
    %c0_i32_1 = arith.constant 0 : i32
    return %c0_i32, %c0_i32_0 : i32, i32
  }
  func.func @transform_10(%arg0: i32) -> (i32, i32) {
    %c0_i32 = arith.constant 0 : i32
    %c0_i32_0 = arith.constant 0 : i32
    %c0_i32_1 = arith.constant 0 : i32
    return %c0_i32, %c0_i32_0 : i32, i32
  }
  func.func @transform_11(%arg0: i32) -> (i32, i32) {
    %c0_i32 = arith.constant 0 : i32
    %c0_i32_0 = arith.constant 0 : i32
    return %arg0, %c0_i32 : i32, i32
  }
}

</mosaic_0001>

<bundles_post_ra>
// kernel: deep_fc_dqn_forward.1
= control target key start
LH: loop header
LB: loop body
LE: loop exit
PB: predicated region body
PF: predicated region fallthrough
CT: control target
= control target key end

     0   :  { %16 = vsyncpa [#allocation3], 0  ;;  %s1264_s0 = inlined_call_operand.vmem [shape: bf16[8,128], index: 0, kind: input, shape index: {}]   ;;  %s1265_s1 = inlined_call_operand.hbm [shape: bf16[128,128], index: 1, kind: input, shape index: {}]   ;;  %s1266_s2 = inlined_call_operand.vmem [shape: f32[1,128], index: 2, kind: input, shape index: {}]   ;;  %s1267_s3 = inlined_call_operand.hbm [shape: bf16[128,128], index: 3, kind: input, shape index: {}]   ;;  %s1268_s4 = inlined_call_operand.vmem [shape: f32[1,128], index: 4, kind: input, shape index: {}]   ;;  %s1269_s5 = inlined_call_operand.hbm [shape: bf16[128,128], index: 5, kind: input, shape index: {}]   ;;  %s1270_s6 = inlined_call_operand.vmem [shape: f32[1,128], index: 6, kind: input, shape index: {}]   ;;  %s1271_s7 = inlined_call_operand.hbm [shape: bf16[128,128], index: 7, kind: input, shape index: {}]   ;;  %s1272_s8 = inlined_call_operand.vmem [shape: f32[1,128], index: 8, kind: input, shape index: {}]   ;;  %s1273_s9 = inlined_call_operand.hbm [shape: bf16[128,128], index: 9, kind: input, shape index: {}]   ;;  %s1274_s10 = inlined_call_operand.vmem [shape: f32[1,128], index: 10, kind: input, shape index: {}]   ;;  %s1275_s11 = inlined_call_operand.vmem [shape: f32[8,4], index: 11, kind: output, shape index: {}]  }
   0x1   :  { %17 = vsyncpa [#allocation5], 0 }
   0x2   :  { %18 = vsyncpa [#allocation8], 0  ;;  %s1035_s17 = smov [#allocation4]   ;;  %s1036_s19 = smov [#allocation7]  }
   0x3   :  { %s40_s18 = sshll.u32 %s1035_s17, 4  ;;  %s68_s20 = sshll.u32 %s1036_s19, 4  ;;  %s41_s18 = int_to_ptr.vmem [resolvable:$true] %s40_s18  ;;  %s1104_s20 = int_to_ptr.vmem [resolvable:$true] %s68_s20 }
   0x4   :  { %s919_s23 = scalar_lea.hbm %s1267_s3, 1024 }
   0x5   :  { %p920_p0 = scmp.ne.s32.totalorder %s1267_s3, %s919_s23  ;;  %p923_p1 = scmp.lt.u32.totalorder %s919_s23, %s1267_s3 }
   0x7   :  { %p925_p2 = pnand %p923_p1, %p920_p0 }
   0x9   :  { %928 = shalt.err (!%p925_p2)
}
   0xa   :  { %s929_s28 = scalar_lea.vmem %s41_s18, 1024  ;;  %p934_p4 = scmp.lt.s32.totalorder %s41_s18, %s41_s18 }
   0xb   :  { %p930_p3 = scmp.ne.s32.totalorder %s41_s18, %s929_s28  ;;  %p935_p5 = scmp.lt.s32.totalorder %s929_s28, %s929_s28 }
   0xd   :  { %p936_p6 = por %p935_p5, %p934_p4 }
   0xf   :  { %p937_p7 = pnand %p936_p6, %p930_p3 }
  0x11   :  { %940 = shalt.err (!%p937_p7)
}
  0x12   :  { %s1037_s29 = smov 64   ;;  %s1038_s30 = smov 4  }
  0x13   :  { %46 = dma.hbm_to_vmem [thread:$0]  %s1267_s3, 1024, %s41_s18, [#allocation5], %s1037_s29, %s1037_s29, %s1038_s30  }
  0x14   :  { %s941_s16 = scalar_lea.hbm %s1271_s7, 1024 }
  0x15   :  { %p942_p8 = scmp.ne.s32.totalorder %s1271_s7, %s941_s16  ;;  %p945_p9 = scmp.lt.u32.totalorder %s941_s16, %s1271_s7 }
  0x17   :  { %p947_p10 = pnand %p945_p9, %p942_p8 }
  0x19   :  { %950 = shalt.err (!%p947_p10)
}
  0x1a   :  { %s951_s23 = scalar_lea.vmem %s1104_s20, 1024  ;;  %p956_p12 = scmp.lt.s32.totalorder %s1104_s20, %s1104_s20 }
  0x1b   :  { %p952_p11 = scmp.ne.s32.totalorder %s1104_s20, %s951_s23  ;;  %p957_p13 = scmp.lt.s32.totalorder %s951_s23, %s951_s23 }
  0x1d   :  { %p958_p0 = por %p957_p13, %p956_p12 }
  0x1f   :  { %p959_p1 = pnand %p958_p0, %p952_p11 }
  0x21   :  { %962 = shalt.err (!%p959_p1)
}
  0x22   :  { %74 = dma.hbm_to_vmem [thread:$0]  %s1271_s7, 1024, %s1104_s20, [#allocation8], %s1037_s29, %s1037_s29, %s1038_s30  }
  0x23   :  { %s1039_s24 = smov [#allocation2]   ;;  %s1040_s26 = smov [#allocation6]  }
  0x24   :  { %s26_s25 = sshll.u32 %s1039_s24, 4  ;;  %s54_s27 = sshll.u32 %s1040_s26, 4  ;;  %s27_s25 = int_to_ptr.vmem [resolvable:$true] %s26_s25  ;;  %s1141_s27 = int_to_ptr.vmem [resolvable:$true] %s54_s27 }
  0x25   :  { %s963_s13 = scalar_lea.hbm %s1265_s1, 1024 }
  0x26   :  { %p964_p2 = scmp.ne.s32.totalorder %s1265_s1, %s963_s13  ;;  %p967_p3 = scmp.lt.u32.totalorder %s963_s13, %s1265_s1 }
  0x28   :  { %p969_p4 = pnand %p967_p3, %p964_p2 }
  0x2a   :  { %972 = shalt.err (!%p969_p4)
}
  0x2b   :  { %s973_s7 = scalar_lea.vmem %s27_s25, 1024  ;;  %p978_p6 = scmp.lt.s32.totalorder %s27_s25, %s27_s25 }
  0x2c   :  { %p974_p5 = scmp.ne.s32.totalorder %s27_s25, %s973_s7  ;;  %p979_p7 = scmp.lt.s32.totalorder %s973_s7, %s973_s7 }
  0x2e   :  { %p980_p8 = por %p979_p7, %p978_p6 }
  0x30   :  { %p981_p9 = pnand %p980_p8, %p974_p5 }
  0x32   :  { %984 = shalt.err (!%p981_p9)
}
  0x33   :  { %32 = dma.hbm_to_vmem [thread:$0]  %s1265_s1, 1024, %s27_s25, [#allocation3], %s1037_s29, %s1037_s29, %s1038_s30  }
  0x34   :  { %s985_s23 = scalar_lea.hbm %s1269_s5, 1024 }
  0x35   :  { %p986_p10 = scmp.ne.s32.totalorder %s1269_s5, %s985_s23  ;;  %p989_p11 = scmp.lt.u32.totalorder %s985_s23, %s1269_s5 }
  0x37   :  { %p991_p12 = pnand %p989_p11, %p986_p10 }
  0x39   :  { %994 = shalt.err (!%p991_p12)
}
  0x3a   :  { %s995_s28 = scalar_lea.vmem %s1141_s27, 1024  ;;  %p1000_p0 = scmp.lt.s32.totalorder %s1141_s27, %s1141_s27 }
  0x3b   :  { %p996_p13 = scmp.ne.s32.totalorder %s1141_s27, %s995_s28  ;;  %p1001_p1 = scmp.lt.s32.totalorder %s995_s28, %s995_s28 }
  0x3d   :  { %p1002_p2 = por %p1001_p1, %p1000_p0 }
  0x3f   :  { %p1003_p3 = pnand %p1002_p2, %p996_p13 }
  0x41   :  { %1006 = shalt.err (!%p1003_p3)
}
  0x42   :  { %60 = dma.hbm_to_vmem [thread:$0]  %s1269_s5, 1024, %s1141_s27, [#allocation5], %s1037_s29, %s1037_s29, %s1038_s30  }
  0x43   :  { %s1041_s12 = smov [#allocation9]   ;;  %s1007_s16 = scalar_lea.hbm %s1273_s9, 1024 }
  0x44   :  { %s82_s13 = sshll.u32 %s1041_s12, 4  ;;  %p1008_p4 = scmp.ne.s32.totalorder %s1273_s9, %s1007_s16  ;;  %s83_s13 = int_to_ptr.vmem [resolvable:$true] %s82_s13 }
  0x45   :  { %p1011_p5 = scmp.lt.u32.totalorder %s1007_s16, %s1273_s9 }
  0x47   :  { %p1013_p6 = pnand %p1011_p5, %p1008_p4 }
  0x49   :  { %1016 = shalt.err (!%p1013_p6)
}
  0x4a   :  { %s1017_s21 = scalar_lea.vmem %s83_s13, 1024  ;;  %p1022_p8 = scmp.lt.s32.totalorder %s83_s13, %s83_s13 }
  0x4b   :  { %p1018_p7 = scmp.ne.s32.totalorder %s83_s13, %s1017_s21  ;;  %p1023_p9 = scmp.lt.s32.totalorder %s1017_s21, %s1017_s21 }
  0x4d   :  { %p1024_p10 = por %p1023_p9, %p1022_p8 }
  0x4f   :  { %p1025_p11 = pnand %p1024_p10, %p1018_p7 }
  0x51   :  { %1028 = shalt.err (!%p1025_p11)
}
  0x52   :  { %88 = dma.hbm_to_vmem [thread:$0]  %s1273_s9, 1024, %s83_s13, [#allocation8], %s1037_s29, %s1037_s29, %s1038_s30  }
  0x53   :  { %1029 = dma.done.wait [#allocation3], 1024  }
  0x54   :  { %1030 = vsyncadd [#allocation3], 4294966272 }
  0x55   :  { %1031 = dma.done.wait [#allocation5], 2048  }
  0x56   :  { %1032 = vsyncadd [#allocation5], 4294965248 }
  0x57   :  { %1033 = dma.done.wait [#allocation8], 2048  }
  0x58   :  { %1034 = vsyncadd [#allocation8], 4294965248  ;;  %v1042_v0 = vmov 0.0   ;;  %vm1043_vm0 = vmmov 0   ;;  %v879_v1 = vld [vmem:[#allocation2] sm:$0xff]   ;;  %v880_v2 = vld [vmem:[#allocation2 + $0x8] sm:$0xff]  }
  0x59   :  { %770 = vmatprep.subr.bf16.mxu0 %v1042_v0  ;;  %786 = vmatprep.mubr.msk.bf16.mxu0 %vm1043_vm0, %v1042_v0  ;;  %v881_v3 = vld [vmem:[#allocation2 + $0x10] sm:$0xff]   ;;  %v887_v4 = vld [vmem:[#allocation4] sm:$0xff]   ;;  %v882_v5 = vld [vmem:[#allocation2 + $0x18] sm:$0xff]   ;;  %vm671_vm1 = vcmask 31744  }
  0x5a   :  { %790 = vmatprep.subr.bf16.mxu1 %v1042_v0  ;;  %806 = vmatprep.mubr.msk.bf16.mxu1 %vm1043_vm0, %v1042_v0  ;;  %v888_v6 = vld [vmem:[#allocation4 + $0x8] sm:$0xff]   ;;  %v883_v7 = vld [vmem:[#allocation2 + $0x20] sm:$0xff]   ;;  %v889_v8 = vld [vmem:[#allocation4 + $0x10] sm:$0xff]  }
  0x5b   :  { %771 = vmatpush3.bf16.msra.mxu0 %v879_v1  ;;  %791 = vmatpush3.bf16.msra.mxu1 %v887_v4  ;;  %v884_v9 = vld [vmem:[#allocation2 + $0x28] sm:$0xff]   ;;  %v890_v10 = vld [vmem:[#allocation4 + $0x18] sm:$0xff]   ;;  %v885_v11 = vld [vmem:[#allocation2 + $0x30] sm:$0xff]  }
  0x5c   :  { %772 = vmatprep.subr.bf16.mxu0 %v1042_v0  ;;  %792 = vmatprep.subr.bf16.mxu1 %v1042_v0  ;;  %v891_v12 = vld [vmem:[#allocation4 + $0x20] sm:$0xff]   ;;  %v886_v13 = vld [vmem:[#allocation2 + $0x38] sm:$0xff]   ;;  %v892_v14 = vld [vmem:[#allocation4 + $0x28] sm:$0xff]  }
  0x5d   :  { %v107_v15 = vld [vmem:[%s1264_s0] sm:$0xf]  ;;  %v893_v16 = vld [vmem:[#allocation4 + $0x30] sm:$0xff]   ;;  %v894_v17 = vld [vmem:[#allocation4 + $0x38] sm:$0xff]  }
  0x5e   :  { %v895_v18 = vld [vmem:[#allocation6] sm:$0xff]   ;;  %v896_v19 = vld [vmem:[#allocation6 + $0x8] sm:$0xff]   ;;  %v897_v20 = vld [vmem:[#allocation6 + $0x10] sm:$0xff]  }
  0x5f   :  { %773 = vmatpush3.bf16.msra.mxu0 %v880_v2  ;;  %793 = vmatpush3.bf16.msra.mxu1 %v888_v6  ;;  %v898_v21 = vld [vmem:[#allocation6 + $0x18] sm:$0xff]   ;;  %v899_v22 = vld [vmem:[#allocation6 + $0x20] sm:$0xff]   ;;  %v900_v23 = vld [vmem:[#allocation6 + $0x28] sm:$0xff]  }
  0x60   :  { %774 = vmatprep.subr.bf16.mxu0 %v1042_v0  ;;  %794 = vmatprep.subr.bf16.mxu1 %v1042_v0  ;;  %v680_v24 = vld [vmem:[%s1266_s2] ss:$0 sm:$0xff]  ;;  %v901_v32 = vld [vmem:[#allocation6 + $0x30] sm:$0xff]   ;;  %v902_v33 = vld [vmem:[#allocation6 + $0x38] sm:$0xff]  }
  0x61   :  { %v903_v34 = vld [vmem:[#allocation7] sm:$0xff]   ;;  %v904_v35 = vld [vmem:[#allocation7 + $0x8] sm:$0xff]   ;;  %v905_v36 = vld [vmem:[#allocation7 + $0x10] sm:$0xff]  }
  0x62   :  { %v906_v37 = vld [vmem:[#allocation7 + $0x18] sm:$0xff]   ;;  %v907_v38 = vld [vmem:[#allocation7 + $0x20] sm:$0xff]   ;;  %v908_v39 = vld [vmem:[#allocation7 + $0x28] sm:$0xff]  }
  0x63   :  { %775 = vmatpush3.bf16.msra.mxu0 %v881_v3  ;;  %795 = vmatpush3.bf16.msra.mxu1 %v889_v8  ;;  %v689_v40 = vld [vmem:[%s1268_s4] ss:$0 sm:$0xff]  ;;  %v909_v48 = vld [vmem:[#allocation7 + $0x30] sm:$0xff]   ;;  %v910_v49 = vld [vmem:[#allocation7 + $0x38] sm:$0xff]  }
  0x64   :  { %776 = vmatprep.subr.bf16.mxu0 %v1042_v0  ;;  %796 = vmatprep.subr.bf16.mxu1 %v1042_v0  ;;  %v911_v50 = vld [vmem:[#allocation9] sm:$0xff]   ;;  %v912_v51 = vld [vmem:[#allocation9 + $0x8] sm:$0xff]   ;;  %v913_v52 = vld [vmem:[#allocation9 + $0x10] sm:$0xff]  }
  0x65   :  { %v914_v53 = vld [vmem:[#allocation9 + $0x18] sm:$0xff]   ;;  %v915_v54 = vld [vmem:[#allocation9 + $0x20] sm:$0xff]   ;;  %v916_v55 = vld [vmem:[#allocation9 + $0x28] sm:$0xff]  }
  0x66   :  { %v698_v56 = vld [vmem:[%s1270_s6] ss:$0 sm:$0xff]  ;;  %v917_v1 = vld [vmem:[#allocation9 + $0x30] sm:$0xff]   ;;  %v918_v2 = vld [vmem:[#allocation9 + $0x38] sm:$0xff]  }
  0x67   :  { %777 = vmatpush3.bf16.msra.mxu0 %v882_v5  ;;  %797 = vmatpush3.bf16.msra.mxu1 %v890_v10  ;;  %v707_v3 = vld [vmem:[%s1272_s8] ss:$0 sm:$0xff] }
  0x68   :  { %778 = vmatprep.subr.bf16.mxu0 %v1042_v0  ;;  %798 = vmatprep.subr.bf16.mxu1 %v1042_v0 }
  0x6b   :  { %779 = vmatpush3.bf16.msra.mxu0 %v883_v7  ;;  %799 = vmatpush3.bf16.msra.mxu1 %v891_v12 }
  0x6c   :  { %780 = vmatprep.subr.bf16.mxu0 %v1042_v0  ;;  %800 = vmatprep.subr.bf16.mxu1 %v1042_v0 }
  0x6f   :  { %781 = vmatpush3.bf16.msra.mxu0 %v884_v9  ;;  %801 = vmatpush3.bf16.msra.mxu1 %v892_v14 }
  0x70   :  { %782 = vmatprep.subr.bf16.mxu0 %v1042_v0  ;;  %802 = vmatprep.subr.bf16.mxu1 %v1042_v0 }
  0x73   :  { %783 = vmatpush3.bf16.msra.mxu0 %v885_v11  ;;  %803 = vmatpush3.bf16.msra.mxu1 %v893_v16  ;;  %v716_v11 = vld [vmem:[%s1274_s10] ss:$0 sm:$0xff] }
  0x74   :  { %784 = vmatprep.subr.bf16.mxu0 %v1042_v0  ;;  %804 = vmatprep.subr.bf16.mxu1 %v1042_v0 }
  0x77   :  { %785 = vmatpush3.bf16.msra.mxu0 %v886_v13  ;;  %805 = vmatpush3.bf16.msra.mxu1 %v894_v17 }
  0x78   :  { %810 = vmatprep.subr.bf16.mxu0 %v1042_v0  ;;  %830 = vmatprep.subr.bf16.mxu1 %v1042_v0 }
  0x7a   :  { %787 = vmatmul.mubr.bf16.vlgmr.msra.gmra.mrb[0].mxu0 %v107_v15 }
  0x7b   :  { %826 = vmatprep.mubr.msk.bf16.mxu0 %vm1043_vm0, %v1042_v0  ;;  %811 = vmatpush3.bf16.msra.mxu0 %v895_v18 }
  0x7c   :  { %812 = vmatprep.subr.bf16.mxu0 %v1042_v0 }
  0x7f   :  { %813 = vmatpush3.bf16.msra.mxu0 %v896_v19 }
  0x80   :  { %814 = vmatprep.subr.bf16.mxu0 %v1042_v0 }
  0x83   :  { %815 = vmatpush3.bf16.msra.mxu0 %v897_v20 }
  0x84   :  { %816 = vmatprep.subr.bf16.mxu0 %v1042_v0 }
  0x87   :  { %817 = vmatpush3.bf16.msra.mxu0 %v898_v21 }
  0x88   :  { %818 = vmatprep.subr.bf16.mxu0 %v1042_v0 }
  0x8b   :  { %819 = vmatpush3.bf16.msra.mxu0 %v899_v22 }
  0x8c   :  { %820 = vmatprep.subr.bf16.mxu0 %v1042_v0 }
  0x8f   :  { %821 = vmatpush3.bf16.msra.mxu0 %v900_v23 }
  0x90   :  { %822 = vmatprep.subr.bf16.mxu0 %v1042_v0 }
  0x93   :  { %823 = vmatpush3.bf16.msra.mxu0 %v901_v32 }
  0x94   :  { %824 = vmatprep.subr.bf16.mxu0 %v1042_v0 }
  0x97   :  { %825 = vmatpush3.bf16.msra.mxu0 %v902_v33 }
  0x98   :  { %850 = vmatprep.subr.bf16.mxu0 %v1042_v0 }
 0x14d   :  { %v217_v25 = vpop.f32.mrb[0].mxu0 }
 0x14e   :  { %v218_v26 = vadd.f32 %v680_v24, %v217_v25  ;;  %v788_v27 = vpop.f32.mrb[1].mxu0 }
 0x14f   :  { %v220_v28 = vpop.f32.mrb[2].mxu0 }
 0x150   :  { %v223_v29 = vmax.f32 %v218_v26, 0.0  ;;  %v789_v30 = vpop.f32.mrb[3].mxu0 }
 0x152   :  { %v224_v31 = vpack.c.bf16 %v223_v29, %v223_v29 }
 0x154   :  { %807 = vmatmul.mubr.bf16.vlgmr.msra.gmra.mrb[0].mxu1 %v224_v31 }
 0x155   :  { %846 = vmatprep.mubr.msk.bf16.mxu1 %vm1043_vm0, %v1042_v0  ;;  %831 = vmatpush3.bf16.msra.mxu1 %v903_v34 }
 0x156   :  { %832 = vmatprep.subr.bf16.mxu1 %v1042_v0 }
 0x159   :  { %833 = vmatpush3.bf16.msra.mxu1 %v904_v35 }
 0x15a   :  { %834 = vmatprep.subr.bf16.mxu1 %v1042_v0 }
 0x15d   :  { %835 = vmatpush3.bf16.msra.mxu1 %v905_v36 }
 0x15e   :  { %836 = vmatprep.subr.bf16.mxu1 %v1042_v0 }
 0x161   :  { %837 = vmatpush3.bf16.msra.mxu1 %v906_v37 }
 0x162   :  { %838 = vmatprep.subr.bf16.mxu1 %v1042_v0 }
 0x165   :  { %839 = vmatpush3.bf16.msra.mxu1 %v907_v38 }
 0x166   :  { %840 = vmatprep.subr.bf16.mxu1 %v1042_v0 }
 0x169   :  { %841 = vmatpush3.bf16.msra.mxu1 %v908_v39 }
 0x16a   :  { %842 = vmatprep.subr.bf16.mxu1 %v1042_v0 }
 0x16d   :  { %843 = vmatpush3.bf16.msra.mxu1 %v909_v48 }
 0x16e   :  { %844 = vmatprep.subr.bf16.mxu1 %v1042_v0 }
 0x171   :  { %845 = vmatpush3.bf16.msra.mxu1 %v910_v49 }
 0x227   :  { %v329_v41 = vpop.f32.mrb[0].mxu1 }
 0x228   :  { %v330_v42 = vadd.f32 %v689_v40, %v329_v41  ;;  %v808_v43 = vpop.f32.mrb[1].mxu1 }
 0x229   :  { %v332_v44 = vpop.f32.mrb[2].mxu1 }
 0x22a   :  { %v335_v45 = vmax.f32 %v330_v42, 0.0  ;;  %v809_v46 = vpop.f32.mrb[3].mxu1 }
 0x22c   :  { %v336_v47 = vpack.c.bf16 %v335_v45, %v335_v45 }
 0x22e   :  { %827 = vmatmul.mubr.bf16.vlgmr.msra.gmra.mrb[4].mxu0 %v336_v47 }
 0x22f   :  { %866 = vmatprep.mubr.msk.bf16.mxu0 %vm1043_vm0, %v1042_v0  ;;  %851 = vmatpush3.bf16.msra.mxu0 %v911_v50 }
 0x230   :  { %852 = vmatprep.subr.bf16.mxu0 %v1042_v0 }
 0x233   :  { %853 = vmatpush3.bf16.msra.mxu0 %v912_v51 }
 0x234   :  { %854 = vmatprep.subr.bf16.mxu0 %v1042_v0 }
 0x237   :  { %855 = vmatpush3.bf16.msra.mxu0 %v913_v52 }
 0x238   :  { %856 = vmatprep.subr.bf16.mxu0 %v1042_v0 }
 0x23b   :  { %857 = vmatpush3.bf16.msra.mxu0 %v914_v53 }
 0x23c   :  { %858 = vmatprep.subr.bf16.mxu0 %v1042_v0 }
 0x23f   :  { %859 = vmatpush3.bf16.msra.mxu0 %v915_v54 }
 0x240   :  { %860 = vmatprep.subr.bf16.mxu0 %v1042_v0 }
 0x243   :  { %861 = vmatpush3.bf16.msra.mxu0 %v916_v55 }
 0x244   :  { %862 = vmatprep.subr.bf16.mxu0 %v1042_v0 }
 0x247   :  { %863 = vmatpush3.bf16.msra.mxu0 %v917_v1 }
 0x248   :  { %864 = vmatprep.subr.bf16.mxu0 %v1042_v0 }
 0x24b   :  { %865 = vmatpush3.bf16.msra.mxu0 %v918_v2 }
 0x301   :  { %v441_v57 = vpop.f32.mrb[4].mxu0 }
 0x302   :  { %v442_v58 = vadd.f32 %v698_v56, %v441_v57  ;;  %v828_v59 = vpop.f32.mrb[5].mxu0 }
 0x303   :  { %v444_v60 = vpop.f32.mrb[6].mxu0 }
 0x304   :  { %v447_v61 = vmax.f32 %v442_v58, 0.0  ;;  %v829_v62 = vpop.f32.mrb[7].mxu0 }
 0x306   :  { %v448_v63 = vpack.c.bf16 %v447_v61, %v447_v61 }
 0x308   :  { %847 = vmatmul.mubr.bf16.vlgmr.msra.gmra.mrb[4].mxu1 %v448_v63 }
 0x3db   :  { %v553_v4 = vpop.f32.mrb[4].mxu1 }
 0x3dc   :  { %v554_v5 = vadd.f32 %v707_v3, %v553_v4  ;;  %v848_v6 = vpop.f32.mrb[5].mxu1 }
 0x3dd   :  { %v556_v7 = vpop.f32.mrb[6].mxu1 }
 0x3de   :  { %v559_v8 = vmax.f32 %v554_v5, 0.0  ;;  %v849_v9 = vpop.f32.mrb[7].mxu1 }
 0x3e0   :  { %v560_v10 = vpack.c.bf16 %v559_v8, %v559_v8 }
 0x3e2   :  { %867 = vmatmul.mubr.bf16.vlgmr.msra.gmra.mrb[8].mxu0 %v560_v10 }
 0x4b5   :  { %v665_v12 = vpop.f32.mrb[8].mxu0 }
 0x4b6   :  { %v666_v0 = vadd.f32 %v716_v11, %v665_v12  ;;  %v868_v13 = vpop.f32.mrb[9].mxu0 }
 0x4b7   :  { %v668_v14 = vpop.f32.mrb[10].mxu0 }
 0x4b8   :  { %672 = vst.msk [vmem:[%s1275_s11] sm:$0xff] %vm671_vm1, %v666_v0  ;;  %v869_v15 = vpop.f32.mrb[11].mxu0 }
 0x4b9   :  { %677 = vsyncpa [#allocation3], 1 }
 0x4ba   :  { %678 = vsyncpa [#allocation5], 1 }
 0x4bb   :  { %679 = vsyncpa [#allocation8], 1 }

</bundles_post_ra>
